<compile_context>
chip_gen: v7x
topology: tpu7x:2x2x1
jax: 0.10.0
libtpu: 0.0.40
codegen_flags: <defaults>
</compile_context>

<pallas_src>
import jax
import jax.numpy as jnp
from jax.experimental import pallas as pl
from jax.experimental.pallas import tpu as pltpu

_EPS = 1e-5  # nn.LayerNorm default


def _cnn_layernorm_kernel(x_ref, gamma_ref, beta_ref, o_ref):
    # x_ref: (1, F, T_tile) -- F on sublanes, T lane-dense.
    # gamma_ref / beta_ref: (F, 1), already float32.
    x = x_ref[0].astype(jnp.float32)                     # (F, T_tile)
    mean = jnp.mean(x, axis=0, keepdims=True)            # (1, T_tile), sublane reduce (XLU)
    centered = x - mean
    var = jnp.mean(centered * centered, axis=0, keepdims=True)  # biased, like PyTorch
    inv = jax.lax.rsqrt(var + _EPS)                      # EUP slot (free-ish)
    y = centered * inv * gamma_ref[...] + beta_ref[...]  # broadcast (F,1) along lanes
    o_ref[0] = y.astype(o_ref.dtype)


def _pick_t_tile(n_feats, t, itemsize):
    """Largest lane tile that fits comfortably in scoped VMEM on all generations."""
    if t <= 256:
        return t  # full extent (block last dim must be a multiple of 128 or the full dim)
    budget = 12 << 20                      # (in + out) x 2 buffers, safe under v5e's 16 MiB
    per_col = 4 * n_feats * max(itemsize, 4)  # f32 accumulation worst case
    max_t = max(128, (budget // per_col) // 128 * 128)
    return min(2048, max_t, pl.cdiv(t, 128) * 128)


def cnn_layer_norm(x, gamma, beta, *, t_tile=None):
    """x: (B, C, F, T) NCHW; gamma, beta: (F,). Returns (B, C, F, T).

    Equivalent to: x.transpose(2,3) -> nn.LayerNorm(F) -> transpose(2,3),
    i.e. normalize over F for every (b, c, t); transposes are fused into the
    kernel's block layout (reduce over sublanes, T stays lane-dense).
    """
    B, C, F, T = x.shape
    x3 = x.reshape(B * C, F, T)            # free: merge leading dims, no data movement
    gamma_f32 = gamma.astype(jnp.float32).reshape(F, 1)
    beta_f32 = beta.astype(jnp.float32).reshape(F, 1)

    if t_tile is None:
        t_tile = _pick_t_tile(F, T, x.dtype.itemsize)
    t_tile = min(t_tile, T)
    grid = (B * C, pl.cdiv(T, t_tile))

    out = pl.pallas_call(
        _cnn_layernorm_kernel,
        out_shape=jax.ShapeDtypeStruct((B * C, F, T), x.dtype),
        grid_spec=pltpu.PrefetchScalarGridSpec(
            num_scalar_prefetch=0,
            grid=grid,
            in_specs=[
                pl.BlockSpec((1, F, t_tile), lambda bc, t: (bc, 0, t)),
                pl.BlockSpec((F, 1), lambda bc, t: (0, 0)),
                pl.BlockSpec((F, 1), lambda bc, t: (0, 0)),
            ],
            out_specs=pl.BlockSpec((1, F, t_tile), lambda bc, t: (bc, 0, t)),
        ),
        compiler_params=pltpu.CompilerParams(
            dimension_semantics=("parallel", "parallel")),
    )(x3, gamma_f32, beta_f32)

    return out.reshape(B, C, F, T)         # free reshape, no transpose


def _reference(x, gamma, beta):
    # pure-JAX reference of the PyTorch forward
    xt = jnp.transpose(x, (0, 1, 3, 2)).astype(jnp.float32)
    mean = jnp.mean(xt, axis=-1, keepdims=True)
    var = jnp.mean((xt - mean) ** 2, axis=-1, keepdims=True)
    y = (xt - mean) / jnp.sqrt(var + _EPS) * gamma + beta
    return jnp.transpose(y, (0, 1, 3, 2)).astype(x.dtype)


def _check(x, gamma, beta, **kw):
    out = jax.block_until_ready(cnn_layer_norm(x, gamma, beta, **kw))
    ref = _reference(x, gamma, beta)
    assert out.shape == x.shape
    err = float(jnp.max(jnp.abs(out - ref)))
    assert jnp.allclose(out, ref, atol=1e-5, rtol=1e-5), err


if __name__ == "__main__":
    key = jax.random.PRNGKey(0)
    kx, kg, kb, kx2 = jax.random.split(key, 4)

    # primary shape (matches the module's NCHW conv-activation layout)
    B, C, F, T = 2, 4, 16, 16
    x = jax.random.normal(kx, (B, C, F, T), dtype=jnp.float32)
    # nn.LayerNorm default init is weight=1, bias=0; perturb deterministically
    # so the affine path is exercised.
    gamma = jnp.ones((F,), jnp.float32) + 0.1 * jax.random.normal(kg, (F,), jnp.float32)
    beta = 0.1 * jax.random.normal(kb, (F,), jnp.float32)
    _check(x, gamma, beta)

    # multi-tile, lane-dense path (T tiled in 128-wide lane blocks)
    T2 = 384
    x2 = jax.random.normal(kx2, (B, C, F, T2), dtype=jnp.float32)
    _check(x2, gamma, beta, t_tile=128)

    print("KERNEL_OK")
</pallas_src>

<mosaic_0001>
module attributes {stable_mosaic.version = 11 : i64} {
  func.func @_cnn_layernorm_kernel(%arg0: i32, %arg1: i32, %arg2: memref<1x16x16xf32, #tpu.memory_space<vmem>>, %arg3: memref<16x1xf32, #tpu.memory_space<vmem>>, %arg4: memref<16x1xf32, #tpu.memory_space<vmem>>, %arg5: memref<1x16x16xf32, #tpu.memory_space<vmem>>) attributes {dimension_semantics = [#tpu.dimension_semantics<parallel>, #tpu.dimension_semantics<parallel>], iteration_bounds = array<i64: 8, 1>, scalar_prefetch = 0 : i64, scratch_operands = 0 : i64, tpu.core_type = #tpu.core_type<tc>, window_params = [{transform_indices = @transform_0, window_bounds = array<i64: 1, 16, 16>}, {pipeline_mode = #tpu.pipeline_mode<synchronous>, transform_indices = @transform_1, window_bounds = array<i64: 16, 1>}, {pipeline_mode = #tpu.pipeline_mode<synchronous>, transform_indices = @transform_2, window_bounds = array<i64: 16, 1>}, {transform_indices = @transform_3, window_bounds = array<i64: 1, 16, 16>}]} {
    %c0 = arith.constant 0 : index
    %c0_0 = arith.constant 0 : index
    %c0_1 = arith.constant 0 : index
    %0 = vector.load %arg2[%c0, %c0_0, %c0_1] : memref<1x16x16xf32, #tpu.memory_space<vmem>>, vector<1x16x16xf32>
    %1 = vector.shape_cast %0 : vector<1x16x16xf32> to vector<16x16xf32>
    %cst = arith.constant dense<0.000000e+00> : vector<16xf32>
    %2 = vector.multi_reduction <add>, %1, %cst [0] : vector<16x16xf32> to vector<16xf32>
    %3 = vector.shape_cast %2 : vector<16xf32> to vector<1x16xf32>
    %cst_2 = arith.constant 1.600000e+01 : f32
    %4 = vector.broadcast %cst_2 : f32 to vector<1x16xf32>
    %5 = arith.divf %3, %4 : vector<1x16xf32>
    %6 = vector.broadcast %5 : vector<1x16xf32> to vector<16x16xf32>
    %7 = arith.subf %1, %6 : vector<16x16xf32>
    %8 = arith.mulf %7, %7 : vector<16x16xf32>
    %cst_3 = arith.constant dense<0.000000e+00> : vector<16xf32>
    %9 = vector.multi_reduction <add>, %8, %cst_3 [0] : vector<16x16xf32> to vector<16xf32>
    %10 = vector.shape_cast %9 : vector<16xf32> to vector<1x16xf32>
    %cst_4 = arith.constant 1.600000e+01 : f32
    %11 = vector.broadcast %cst_4 : f32 to vector<1x16xf32>
    %12 = arith.divf %10, %11 : vector<1x16xf32>
    %cst_5 = arith.constant 9.99999974E-6 : f32
    %13 = vector.broadcast %cst_5 : f32 to vector<1x16xf32>
    %14 = arith.addf %12, %13 : vector<1x16xf32>
    %15 = math.rsqrt %14 : vector<1x16xf32>
    %16 = vector.broadcast %15 : vector<1x16xf32> to vector<16x16xf32>
    %17 = arith.mulf %7, %16 : vector<16x16xf32>
    %c0_6 = arith.constant 0 : index
    %c0_7 = arith.constant 0 : index
    %18 = vector.load %arg3[%c0_6, %c0_7] : memref<16x1xf32, #tpu.memory_space<vmem>>, vector<16x1xf32>
    %19 = vector.broadcast %18 : vector<16x1xf32> to vector<16x16xf32>
    %20 = arith.mulf %17, %19 : vector<16x16xf32>
    %c0_8 = arith.constant 0 : index
    %c0_9 = arith.constant 0 : index
    %21 = vector.load %arg4[%c0_8, %c0_9] : memref<16x1xf32, #tpu.memory_space<vmem>>, vector<16x1xf32>
    %22 = vector.broadcast %21 : vector<16x1xf32> to vector<16x16xf32>
    %23 = arith.addf %20, %22 : vector<16x16xf32>
    %c0_10 = arith.constant 0 : index
    %c0_11 = arith.constant 0 : index
    %c0_12 = arith.constant 0 : index
    %24 = vector.load %arg5[%c0_10, %c0_11, %c0_12] : memref<1x16x16xf32, #tpu.memory_space<vmem>>, vector<1x16x16xf32>
    %25 = vector.shape_cast %24 : vector<1x16x16xf32> to vector<16x16xf32>
    %26 = vector.shape_cast %23 : vector<16x16xf32> to vector<1x16x16xf32>
    tpu.vector_store %arg5[%c0_10, %c0_11, %c0_12], %26 {strides = array<i32>} : memref<1x16x16xf32, #tpu.memory_space<vmem>>, vector<1x16x16xf32>,
    return
  }
  func.func @transform_0(%arg0: i32, %arg1: i32) -> (i32, i32, i32) {
    %c0_i32 = arith.constant 0 : i32
    %c0_i32_0 = arith.constant 0 : i32
    return %arg0, %c0_i32, %arg1 : i32, i32, i32
  }
  func.func @transform_1(%arg0: i32, %arg1: i32) -> (i32, i32) {
    %c0_i32 = arith.constant 0 : i32
    %c0_i32_0 = arith.constant 0 : i32
    %c0_i32_1 = arith.constant 0 : i32
    return %c0_i32, %c0_i32_0 : i32, i32
  }
  func.func @transform_2(%arg0: i32, %arg1: i32) -> (i32, i32) {
    %c0_i32 = arith.constant 0 : i32
    %c0_i32_0 = arith.constant 0 : i32
    %c0_i32_1 = arith.constant 0 : i32
    return %c0_i32, %c0_i32_0 : i32, i32
  }
  func.func @transform_3(%arg0: i32, %arg1: i32) -> (i32, i32, i32) {
    %c0_i32 = arith.constant 0 : i32
    %c0_i32_0 = arith.constant 0 : i32
    return %arg0, %c0_i32, %arg1 : i32, i32, i32
  }
}

</mosaic_0001>

<bundles_post_ra>
// kernel: tpu_custom_call.1
= control target key start
LH: loop header
LB: loop body
LE: loop exit
PB: predicated region body
PF: predicated region fallthrough
CT: control target
= control target key end

     0   :  { %8 = vsyncpa [#allocation3], 0  ;;  %s792_s0 = inlined_call_operand.hbm [shape: f32[8,16,16], index: 0, kind: input, shape index: {}]   ;;  %s793_s1 = inlined_call_operand.vmem [shape: f32[16,1], index: 1, kind: input, shape index: {}]   ;;  %s794_s2 = inlined_call_operand.vmem [shape: f32[16,1], index: 2, kind: input, shape index: {}]   ;;  %s795_s3 = inlined_call_operand.hbm [shape: f32[8,16,16], index: 3, kind: output, shape index: {}]  }
   0x1   :  { %10 = vsyncpa [#allocation3 + $0x1], 0 }
   0x2   :  { %11 = vsyncpa [#allocation4], 0 }
   0x3   :  { %13 = vsyncpa [#allocation4 + $0x1], 0  ;;  %s597_s12 = smov 0   ;;  %s599_s13 = smov 0  }
   0x4   :  { %s601_s14 = smov 0   ;;  %s603_s15 = smov 0  }
   0x5   :  { %s605_s16 = smov 0   ;;  %s607_s17 = smov 0  }
   0x6 LB: > { %s368_s18 = sadd.s32 4294967295, %s568_s17   ;;  %s369_s19 = sadd.s32 4294967294, %s568_s17   ;;  %s568_s17 = sphi %s607_s17, %s19_s17   ;;  %s564_s16 = sphi %s605_s16, %s809_s16   ;;  %s560_s15 = sphi %s603_s15, %s808_s15   ;;  %s556_s14 = sphi %s601_s14, %s807_s14   ;;  %s552_s13 = sphi %s599_s13, %s806_s13   ;;  %s548_s12 = sphi %s597_s12, %s805_s12  }
   0x7   : > { %s31_s20 = sadd.s32 1, %s564_s16  ;;  %s40_s21 = sadd.s32 1, %s556_s14 }
   0x8   : > { %p33_p0 = scmp.ge.s32.totalorder %s31_s20, 8  ;;  %p47_p1 = scmp.ne.s32.totalorder %s556_s14, %s552_s13 }
   0x9   : > { %p48_p2 = scmp.eq.s32.totalorder %s568_s17, 0  ;;  %p53_p3 = scmp.ne.s32.totalorder %s552_s13, %s548_s12 }
   0xa   : > { %s811_s20 = smov (%p33_p0, %s31_s20), 0  ;;  %p54_p5 = scmp.eq.s32.totalorder %s368_s18, 0 }
   0xb   : > { %p638_p4 = por %p48_p2, %p47_p1  ;;  %s35_s23 = ssub.s32 %s564_s16, %s811_s20 }
   0xc   : > { %p121_p6 = scmp.eq.s32.totalorder %s368_s18, 7  ;;  %p38_p7 = scmp.eq.s32.totalorder %s35_s23, 0 }
   0xd   : > { %p644_p8 = por %p54_p5, %p53_p3  ;;  %p127_p10 = scmp.eq.s32.totalorder %s369_s19, 7 }
   0xe   : > { %p648_p9 = por %p121_p6, %p47_p1  ;;  %p397_p12 = scmp.lt.s32.totalorder %s568_s17, 8 }
   0xf   : > { %s653_s26 = scalar_select %p38_p7, %s556_s14, %s40_s21  }
  0x10   : > { %s799_s25 = scalar_select %p648_p9, 1, 0 }
  0x11   : > { %p655_p11 = por %p127_p10, %p53_p3  ;;  %s153_s28 = sand.u32 1, %s556_s14  }
  0x12   : > { %s372_s29 = sshll.u32 %s153_s28, 4  ;;  %s383_s30 = sshll.u32 %s564_s16, 8 }
  0x13   : > { %s800_s27 = scalar_select %p655_p11, 1, 0 }
  0x14   : > { %s665_s6 = scalar_lea.hbm %s792_s0, %s383_s30  ;;  %s157_s7 = scalar_lea.vmem [#allocation2], %s372_s29 }
  0x15   : > { %s165_s8 = sshll.u32 %s157_s7, 4  ;;  %p671_p13 = pnand %p397_p12, %p638_p4  ;;  %s667_s8 = int_to_ptr.vmem [resolvable:$true] %s165_s8 }
  0x16   : > { %s676_s10 = scalar_lea.sflag [#allocation3], %s153_s28  ;;  %s456_s11 = scalar_lea.hbm %s665_s6, 256 }
  0x17   : > { %p457_p1 = scmp.ne.s32.totalorder %s665_s6, %s456_s11  ;;  %p458_p2 = pneg %p671_p13 }
  0x18   : > { %s461_s21 = scalar_lea.hbm %s792_s0, 2048  ;;  %p462_p4 = scmp.lt.u32.totalorder %s665_s6, %s792_s0 }
  0x19   : > { %p459_p3 = pnand %p458_p2, %p457_p1  ;;  %p463_p6 = scmp.lt.u32.totalorder %s461_s21, %s456_s11 }
  0x1a   : > { %p465_p10 = scmp.lt.u32.totalorder %s456_s11, %s665_s6 }
  0x1b   : > { %p460_p5 = pneg %p459_p3  ;;  %p464_p7 = por %p463_p6, %p462_p4 }
  0x1d   : > { %p466_p12 = por %p465_p10, %p464_p7 }
  0x1f   : > { %p467_p0 = pnand %p466_p12, %p460_p5 }
  0x21   : > { %470 = shalt.err (!%p467_p0)
}
  0x22   : > { %s471_s28 = scalar_lea.vmem %s667_s8, 256  ;;  %s570_s29 = smov [#allocation2]  }
  0x23   : > { %p472_p1 = scmp.ne.s32.totalorder %s667_s8, %s471_s28  ;;  %s476_s30 = sshll.u32 %s570_s29, 4  ;;  %s477_s30 = int_to_ptr.vmem [resolvable:$false] %s476_s30 }
  0x24   : > { %s478_s4 = scalar_lea.vmem %s477_s30, 512  ;;  %p479_p9 = scmp.lt.s32.totalorder %s667_s8, %s477_s30 }
  0x25   : > { %p474_p3 = pnand %p472_p1, %p458_p2  ;;  %p480_p4 = scmp.lt.s32.totalorder %s478_s4, %s471_s28 }
  0x27   : > { %p475_p11 = pneg %p474_p3  ;;  %p481_p6 = por %p480_p4, %p479_p9 }
  0x29   : > { %p482_p7 = pnand %p481_p6, %p475_p11 }
  0x2b   : > { %485 = shalt.err (!%p482_p7)
}
  0x2c   : > { %s571_s5 = smov 128   ;;  %s572_s7 = smov 8  }
  0x2d   : > { %392 = dma.hbm_to_vmem [thread:$0]  (!%p671_p13), %s665_s6, 256, %s667_s8, %s676_s10, %s571_s5, %s571_s5, %s572_s7  }
  0x2e   : > { %p173_p0 = scmp.lt.s32.totalorder %s568_s17, 9  ;;  %p802_p2 = scmp.ge.s32.totalorder %s568_s17, 1 }
  0x30   : > { %p174_p5 = pnand %p802_p2, %p173_p0 }
  0x31   : > { %s708_s11 = sand.u32 (!%p174_p5), 1, %s552_s13  }
  0x32   : > { %177 = sbr.rel (%p174_p5) target bundleno = 211 (0xd3), region = 32  ;;  %s376_s18 = sshll.u32 (!%p174_p5), %s708_s11, 4 }
  0x33   : > { %s180_s19 = scalar_lea.sflag (!%p174_p5), [#allocation3], %s708_s11  ;;  %s183_s21 = scalar_lea.vmem (!%p174_p5), [#allocation2], %s376_s18 }
  0x39   : > { %539 = dma.done.wait (%p644_p8), %s180_s19, 256  }
  0x3a   : > { %541 = vsyncadd (%p644_p8), %s180_s19, 4294967040  ;;  %v573_v0 = vmov 0   ;;  %v252_v1 = vld [vmem:[%s794_s2] sm:$0xff]  ;;  %v253_v3 = vld [vmem:[%s794_s2 + $0x8] sm:$0xff]  ;;  %vm208_vm0 = vcmask 130048   ;;  %s384_s29 = sshll.u32 %s560_s15, 8 }
  0x3b   : > { %453 = vset.pattern.permute.xlu1 %v573_v0  ;;  %452 = vset.pattern.permute.xlu0 %v573_v0  ;;  %v238_v2 = vld [vmem:[%s793_s1] sm:$0xff]  ;;  %v239_v4 = vld [vmem:[%s793_s1 + $0x8] sm:$0xff]  ;;  %s205_s30 = scalar_lea.vmem [#allocation5], %s376_s18  ;;  %s741_s19 = scalar_lea.hbm %s795_s3, %s384_s29 }
  0x3c   : > { %256 = vperm.xlu1 %453, %v252_v1   ;;  %242 = vperm.xlu0 %452, %v238_v2   ;;  %v206_v5 = vld [vmem:[%s183_s21] sm:$0xff]  ;;  %v207_v6 = vld [vmem:[%s183_s21 + $0x8] sm:$0xff]  ;;  %s283_s4 = sshll.u32 %s205_s30, 4  ;;  %s269_s15 = scalar_lea.sflag [#allocation4], %s708_s11  ;;  %s743_s4 = int_to_ptr.vmem [resolvable:$true] %s283_s4 }
  0x3d   : > { %v209_v7 = vsel %vm208_vm0, %v206_v5, 0.0  ;;  %v210_v8 = vsel %vm208_vm0, %v207_v6, 0.0  ;;  %s486_s18 = scalar_lea.vmem %s743_s4, 256  ;;  %p803_p9 = scmp.ne.s32.totalorder %s799_s25, 0 }
  0x3e   : > { %v211_v9 = vadd.f32 %v210_v8, %v209_v7  ;;  %p487_p8 = scmp.ne.s32.totalorder %s743_s4, %s486_s18  ;;  %s574_s21 = smov [#allocation5]  }
  0x3f   : > { %s490_s6 = sshll.u32 %s574_s21, 4  ;;  %s491_s6 = int_to_ptr.vmem [resolvable:$false] %s490_s6 }
  0x40   : > { %261 = vperm.xlu1 %453, %v253_v3   ;;  %247 = vperm.xlu0 %452, %v239_v4   ;;  %v212_v10 = vrot.slane %v211_v9, 4  ;;  %p488_p11 = pnand %p487_p8, %p803_p9  ;;  %s492_s8 = scalar_lea.vmem %s491_s6, 512 }
  0x41   : > { %p493_p10 = scmp.lt.s32.totalorder %s743_s4, %s491_s6  ;;  %p494_p12 = scmp.lt.s32.totalorder %s492_s8, %s486_s18 }
  0x42   : > { %v213_v11 = vadd.f32 %v212_v10, %v211_v9  ;;  %p489_p13 = pneg %p488_p11 }
  0x43   : > { %p495_p1 = por %p494_p12, %p493_p10 }
  0x44   : > { %v214_v12 = vrot.slane %v213_v11, 2 }
  0x45   : > { %p496_p3 = pnand %p495_p1, %p489_p13 }
  0x46   : > { %v215_v13 = vadd.f32 %v214_v12, %v213_v11 }
  0x48   : > { %v216_v14 = vrot.slane %v215_v13, 1 }
  0x4a   : > { %v217_v15 = vadd.f32 %v216_v14, %v215_v13 }
  0x4c   : > { %v219_v16 = vmul.f32 0.0625, %v217_v15 }
  0x4e   : > { %v220_v17 = vsub.f32 %v206_v5, %v219_v16  ;;  %v221_v18 = vsub.f32 %v207_v6, %v219_v16 }
  0x50   : > { %v222_v19 = vmul.f32 %v220_v17, %v220_v17  ;;  %v223_v20 = vmul.f32 %v221_v18, %v221_v18 }
  0x52   : > { %v224_v21 = vsel %vm208_vm0, %v222_v19, 0.0  ;;  %v225_v22 = vsel %vm208_vm0, %v223_v20, 0.0 }
  0x53   : > { %v226_v23 = vadd.f32 %v225_v22, %v224_v21 }
  0x55   : > { %v227_v24 = vrot.slane %v226_v23, 4 }
  0x57   : > { %v228_v25 = vadd.f32 %v227_v24, %v226_v23 }
  0x59   : > { %v229_v26 = vrot.slane %v228_v25, 2 }
  0x5b   : > { %v230_v27 = vadd.f32 %v229_v26, %v228_v25 }
  0x5d   : > { %v231_v28 = vrot.slane %v230_v27, 1 }
  0x5f   : > { %v232_v29 = vadd.f32 %v231_v28, %v230_v27 }
  0x61   : > { %v233_v30 = vmul.f32 0.0625, %v232_v29 }
  0x63   : > { %v234_v31 = vadd.f32 1e-05, %v233_v30 }
  0x65   : > { %454 = vrsqrt.f32 %v234_v31 }
  0x6f   : > { %v455_v32 = vpop.eup %454 }
  0x70   : > { %v236_v33 = vmul.f32 %v455_v32, %v220_v17  ;;  %v237_v37 = vmul.f32 %v455_v32, %v221_v18 }
  0xbb   : > { %v257_v34 = vpop.permute.xlu1 %256  ;;  %v243_v35 = vpop.permute.xlu0 %242 }
  0xbc   : > { %v250_v36 = vmul.f32 %v243_v35, %v236_v33 }
  0xbe   : > { %v264_v38 = vadd.f32 %v257_v34, %v250_v36 }
  0xbf   : > { %v248_v39 = vpop.permute.xlu0 %247  ;;  %v262_v41 = vpop.permute.xlu1 %261 }
  0xc0   : > { %266 = vst.msk [vmem:[%s205_s30] sm:$0xff] %vm208_vm0, %v264_v38  ;;  %v251_v40 = vmul.f32 %v248_v39, %v237_v37 }
  0xc2   : > { %v265_v42 = vadd.f32 %v262_v41, %v251_v40 }
  0xc4   : > { %267 = vst.msk [vmem:[%s205_s30 + $0x8] sm:$0xff] %vm208_vm0, %v265_v42 }
  0xc5   : > { %499 = shalt.err (!%p496_p3)
}
  0xc6   : > { %s500_s9 = scalar_lea.hbm %s741_s19, 256  ;;  %s504_s23 = scalar_lea.hbm %s795_s3, 2048 }
  0xc7   : > { %p501_p4 = scmp.ne.s32.totalorder %s741_s19, %s500_s9  ;;  %p505_p0 = scmp.lt.u32.totalorder %s741_s19, %s795_s3 }
  0xc8   : > { %p506_p2 = scmp.lt.u32.totalorder %s504_s23, %s500_s9  ;;  %p508_p8 = scmp.lt.u32.totalorder %s500_s9, %s741_s19 }
  0xc9   : > { %p502_p6 = pnand %p501_p4, %p803_p9 }
  0xca   : > { %p507_p5 = por %p506_p2, %p505_p0 }
  0xcb   : > { %p503_p7 = pneg %p502_p6 }
  0xcc   : > { %p509_p11 = por %p508_p8, %p507_p5 }
  0xce   : > { %p510_p13 = pnand %p509_p11, %p503_p7 }
  0xd0   : > { %513 = shalt.err (!%p510_p13)
}
  0xd1   : > { %s575_s29 = smov 128   ;;  %s576_s30 = smov 8  }
  0xd2   : > { %387 = dma.vmem_to_hbm [thread:$0]  (%p803_p9), %s743_s4, 256, %s741_s19, %s269_s15, %s575_s29, %s575_s29, %s576_s30  }
  0xd3 PF: > { %p398_p10 = scmp.ge.s32.totalorder %s568_s17, 2  ;;  %s298_s5 = sand.u32 1, %s548_s12  }
  0xd4   : > { %p804_p12 = scmp.ne.s32.totalorder %s800_s27, 0  ;;  %s299_s7 = scalar_lea.sflag [#allocation4], %s298_s5 }
  0xd6   : > { %p394_p1 = pnand %p398_p10, %p804_p12 }
  0xd8   : > { %543 = dma.done.wait (!%p394_p1), %s299_s7, 256  }
  0xd9   : > { %545 = vsyncadd (!%p394_p1), %s299_s7, 4294967040  ;;  %s19_s17 = sadd.s32 1, %s568_s17   ;;  %s805_s12 = smov %s552_s13 }
  0xda   : > { %p16_p3 = scmp.ge.s32.totalorder %s19_s17, 10   ;;  %s806_s13 = smov %s556_s14 }
  0xdb   : > { %s807_s14 = smov %s653_s26  ;;  %s808_s15 = smov %s564_s16 }
  0xdc   : > { %s809_s16 = smov %s811_s20  ;;  %18 = sbr.rel (!%p16_p3) target bundleno = 6 (0x6), region = 77 }
  0xe3   :  { %304 = vsyncpa [#allocation3], 1 }
  0xe4   :  { %306 = vsyncpa [#allocation3 + $0x1], 1 }
  0xe5   :  { %307 = vsyncpa [#allocation4], 1 }
  0xe6   :  { %309 = vsyncpa [#allocation4 + $0x1], 1 }

</bundles_post_ra>
